<compile_context>
chip_gen: v6e
topology: v6e:2x2x1
jax: 0.10.0
libtpu: 0.0.40
codegen_flags: <defaults>
</compile_context>

<pallas_src>
import jax
import jax.numpy as jnp
import numpy as np
from jax import lax
from jax.experimental import pallas as pl
from jax.experimental.pallas import tpu as pltpu


# ----------------------------------------------------------------- parameters
def prepare_fused_params(params, hidden_size, weight_dtype=jnp.float32):
    """Hoisted (run once per parameter set): fuse i2h/h2h weights & biases.

    params: 'i2h_w' (4H, F), 'i2h_b' (4H,), 'h2h_w' (4H, H), 'h2h_b' (4H,)
    returns w_fused (F+H, 4H) pre-transposed (optionally bf16),
            b_fused (1, 4H) f32 = b_i2h + b_h2h
    """
    H = hidden_size
    w_fused = jnp.concatenate(
        [jnp.asarray(params["i2h_w"]).T, jnp.asarray(params["h2h_w"]).T],
        axis=0).astype(weight_dtype)
    b_fused = (jnp.asarray(params["i2h_b"], jnp.float32)
               + jnp.asarray(params["h2h_b"], jnp.float32)).reshape(1, 4 * H)
    return w_fused, b_fused


# ---------------------------------------------------------------- gate math
def _gate_math(preact, c, H):
    """f32 gate math. Gate order along 4H matches MetaLSTMCell: i, f, o, g."""
    gates = jax.nn.sigmoid(preact[:, : 3 * H])   # one EUP pass, contiguous slice
    g_t = jnp.tanh(preact[:, 3 * H:])
    i_t = gates[:, 0 * H: 1 * H]
    f_t = gates[:, 1 * H: 2 * H]
    o_t = gates[:, 2 * H: 3 * H]
    c_t = c * f_t + i_t * g_t
    h_t = o_t * jnp.tanh(c_t)
    return h_t, c_t


# ------------------------------------------------------- single-step kernel
def _lstm_cell_kernel(x_ref, h_ref, c_ref, w_ref, b_ref, h_out_ref, c_out_ref):
    H = h_ref.shape[1]
    F_in = x_ref.shape[1]
    act_dtype = w_ref.dtype   # bf16 weights => bf16 MXU inputs (explicit choice)
    # Two accumulated dots on static Ref slices of the resident fused weight.
    preact = (
        jnp.dot(x_ref[...].astype(act_dtype), w_ref[:F_in, :],
                preferred_element_type=jnp.float32)
        + jnp.dot(h_ref[...].astype(act_dtype), w_ref[F_in:, :],
                  preferred_element_type=jnp.float32)
        + b_ref[...]
    )
    h_t, c_t = _gate_math(preact, c_ref[...].astype(jnp.float32), H)
    h_out_ref[...] = h_t.astype(h_out_ref.dtype)
    c_out_ref[...] = c_t.astype(c_out_ref.dtype)


def meta_lstm_cell_fused(x, hidden, w_fused, b_fused):
    """Single step with fused params (prepared once with prepare_fused_params).

    NOTE: calling this from an external Python time loop re-dispatches and
    re-DMAs W every step; prefer meta_lstm_sequence_fused for sequences.
    """
    h, c = hidden
    B, H = h.shape
    vmem = pl.BlockSpec(memory_space=pltpu.MemorySpace.VMEM)
    return pl.pallas_call(
        _lstm_cell_kernel,
        out_shape=(jax.ShapeDtypeStruct((B, H), h.dtype),
                   jax.ShapeDtypeStruct((B, H), c.dtype)),
        in_specs=[vmem] * 5,
        out_specs=(vmem, vmem),
    )(x, h, c, w_fused, b_fused)


def meta_lstm_cell(x, hidden, params):
    """API-parity wrapper (PyTorch-style params). Prefer hoisting
    prepare_fused_params out of the step loop and calling meta_lstm_cell_fused."""
    H = hidden[0].shape[1]
    w_fused, b_fused = prepare_fused_params(params, H)
    return meta_lstm_cell_fused(x, hidden, w_fused, b_fused)


# ------------------------------------------------------ sequence-fused kernel
def _lstm_seq_kernel(x_ref, h0_ref, c0_ref, w_ref, b_ref,
                     h_out_ref, c_out_ref, h_sc, c_sc):
    tb = pl.program_id(0)
    t_blk, B, F_in = x_ref.shape
    H = h_sc.shape[1]
    act_dtype = w_ref.dtype

    @pl.when(tb == 0)
    def _():
        h_sc[...] = h0_ref[...].astype(jnp.float32)
        c_sc[...] = c0_ref[...].astype(jnp.float32)

    # Bias broadcast hoisted out of the unrolled time loop.
    bias = jnp.broadcast_to(b_ref[...], (B, 4 * H))

    def step(t, carry):
        h, c = carry
        # Two dots on static Ref slices of the resident W (no lane-axis concat);
        # the W loads sit next to their matmul pushes inside the loop body.
        preact = (
            jnp.dot(x_ref[t].astype(act_dtype), w_ref[:F_in, :],
                    preferred_element_type=jnp.float32)
            + jnp.dot(h.astype(act_dtype), w_ref[F_in:, :],
                      preferred_element_type=jnp.float32)
            + bias
        )
        return _gate_math(preact, c, H)

    # h/c carried in registers across the unrolled time block; VMEM scratch is
    # touched once per grid step.  unroll=True exposes the whole block to the
    # LLO scheduler.
    h, c = lax.fori_loop(0, t_blk, step, (h_sc[...], c_sc[...]), unroll=True)
    h_sc[...] = h
    c_sc[...] = c

    @pl.when(tb == pl.num_programs(0) - 1)
    def _():
        h_out_ref[...] = h.astype(h_out_ref.dtype)
        c_out_ref[...] = c.astype(c_out_ref.dtype)


def meta_lstm_sequence_fused(xs, hidden, w_fused, b_fused, *, t_block=8):
    """Run T recurrent steps in one pallas_call with time-axis blocking.

    xs: (T, B, F); hidden: (h0, c0) each (B, H). Returns final (h_T, c_T).
    Weights/bias stay VMEM-resident across the whole sequence (constant
    index_maps), x is streamed in blocks of t_block timesteps, h/c live in
    VMEM scratch; only the final state is written back to HBM.
    """
    T, B, F_in = xs.shape
    h0, c0 = hidden
    H = h0.shape[1]
    t_blk = max(1, min(int(t_block), T))
    while T % t_blk != 0:          # largest block that divides T
        t_blk -= 1
    grid = (T // t_blk,)

    return pl.pallas_call(
        _lstm_seq_kernel,
        out_shape=(jax.ShapeDtypeStruct((B, H), h0.dtype),
                   jax.ShapeDtypeStruct((B, H), c0.dtype)),
        grid_spec=pltpu.PrefetchScalarGridSpec(
            num_scalar_prefetch=0,
            grid=grid,
            in_specs=[
                pl.BlockSpec((t_blk, B, F_in), lambda i: (i, 0, 0)),   # x block
                pl.BlockSpec((B, H), lambda i: (0, 0)),                # h0 resident
                pl.BlockSpec((B, H), lambda i: (0, 0)),                # c0 resident
                pl.BlockSpec((F_in + H, 4 * H), lambda i: (0, 0)),     # W resident
                pl.BlockSpec((1, 4 * H), lambda i: (0, 0)),            # b resident
            ],
            out_specs=(
                pl.BlockSpec((B, H), lambda i: (0, 0)),
                pl.BlockSpec((B, H), lambda i: (0, 0)),
            ),
            scratch_shapes=[pltpu.VMEM((B, H), jnp.float32),
                            pltpu.VMEM((B, H), jnp.float32)],
        ),
        compiler_params=pltpu.CompilerParams(
            dimension_semantics=("arbitrary",)),   # recurrent time axis
    )(xs, h0, c0, w_fused, b_fused)


# -------------------------------------------------------------- pure-JAX refs
def meta_lstm_cell_ref(x, hidden, params):
    """Mirrors the PyTorch MetaLSTMCell.forward exactly (unfused params)."""
    h, c = hidden
    H = h.shape[1]
    preact = (x @ params["i2h_w"].T + params["i2h_b"]
              + h @ params["h2h_w"].T + params["h2h_b"])
    gates = jax.nn.sigmoid(preact[:, :3 * H])
    g_t = jnp.tanh(preact[:, 3 * H:])
    i_t = gates[:, :H]
    f_t = gates[:, H:2 * H]
    o_t = gates[:, -H:]
    c_t = c * f_t + i_t * g_t
    h_t = o_t * jnp.tanh(c_t)
    return h_t, c_t


def meta_lstm_sequence_ref(xs, hidden, params):
    h, c = hidden
    for t in range(xs.shape[0]):
        h, c = meta_lstm_cell_ref(xs[t], (h, c), params)
    return h, c


# ---------------------------------------------------------------------- main
if __name__ == "__main__":
    # TPU-friendly small shapes: F = H = 128 -> vreg-aligned gate slices and
    # lane-dense (128-lane) outputs; B = 8 matches the sublane count.
    # T = 16, T_BLK = 8 exercises the time-blocked grid (2 grid steps).
    B, F_IN, H, T, T_BLK = 8, 128, 128, 16, 8

    key = jax.random.PRNGKey(0)
    k_x, k_xs, k_h, k_c, k_wi, k_bi, k_wh, k_bh = jax.random.split(key, 8)

    # reset_parameters(): every parameter ~ U(-std, std), std = 1/sqrt(H)
    std = 1.0 / float(np.sqrt(H))
    params = {
        "i2h_w": jax.random.uniform(k_wi, (4 * H, F_IN), jnp.float32, -std, std),
        "i2h_b": jax.random.uniform(k_bi, (4 * H,), jnp.float32, -std, std),
        "h2h_w": jax.random.uniform(k_wh, (4 * H, H), jnp.float32, -std, std),
        "h2h_b": jax.random.uniform(k_bh, (4 * H,), jnp.float32, -std, std),
    }

    x = jax.random.normal(k_x, (B, F_IN), jnp.float32)
    xs = jax.random.normal(k_xs, (T, B, F_IN), jnp.float32)
    h0 = jax.random.normal(k_h, (B, H), jnp.float32)
    c0 = jax.random.normal(k_c, (B, H), jnp.float32)

    # Parameter fusion hoisted out of the forward path (done once).
    w_fused, b_fused = prepare_fused_params(params, H)
    w_fused, b_fused = jax.block_until_ready((w_fused, b_fused))

    cell_fn = jax.jit(meta_lstm_cell_fused)
    seq_fn = jax.jit(meta_lstm_sequence_fused, static_argnames=("t_block",))

    # ---- single step (matches MetaLSTMCell.forward), f32 ----
    h_t, c_t = cell_fn(x, (h0, c0), w_fused, b_fused)
    jax.block_until_ready((h_t, c_t))
    h_ref, c_ref = meta_lstm_cell_ref(x, (h0, c0), params)
    np.testing.assert_allclose(np.asarray(h_t), np.asarray(h_ref), rtol=1e-5, atol=1e-5)
    np.testing.assert_allclose(np.asarray(c_t), np.asarray(c_ref), rtol=1e-5, atol=1e-5)

    # ---- T recurrent steps, time-blocked into one pallas_call, f32 ----
    h_T, c_T = seq_fn(xs, (h0, c0), w_fused, b_fused, t_block=T_BLK)
    jax.block_until_ready((h_T, c_T))
    h_Tr, c_Tr = meta_lstm_sequence_ref(xs, (h0, c0), params)
    np.testing.assert_allclose(np.asarray(h_T), np.asarray(h_Tr), rtol=1e-4, atol=1e-4)
    np.testing.assert_allclose(np.asarray(c_T), np.asarray(c_Tr), rtol=1e-4, atol=1e-4)

    # ---- bf16 fused weights (f32 accumulation + f32 gate math/state) ----
    w_bf16, b_f32 = prepare_fused_params(params, H, weight_dtype=jnp.bfloat16)
    h_Tb, c_Tb = seq_fn(xs, (h0, c0), w_bf16, b_f32, t_block=T_BLK)
    jax.block_until_ready((h_Tb, c_Tb))
    np.testing.assert_allclose(np.asarray(h_Tb), np.asarray(h_Tr), rtol=0, atol=5e-2)
    np.testing.assert_allclose(np.asarray(c_Tb), np.asarray(c_Tr), rtol=0, atol=5e-2)

    print("KERNEL_OK")
</pallas_src>

<mosaic_0001>
module attributes {stable_mosaic.version = 11 : i64} {
  func.func @_lstm_cell_kernel(%arg0: memref<8x128xf32, #tpu.memory_space<vmem>>, %arg1: memref<8x128xf32, #tpu.memory_space<vmem>>, %arg2: memref<8x128xf32, #tpu.memory_space<vmem>>, %arg3: memref<256x512xf32, #tpu.memory_space<vmem>>, %arg4: memref<1x512xf32, #tpu.memory_space<vmem>>, %arg5: memref<8x128xf32, #tpu.memory_space<vmem>>, %arg6: memref<8x128xf32, #tpu.memory_space<vmem>>) attributes {dimension_semantics = [], scalar_prefetch = 0 : i64, scratch_operands = 0 : i64, tpu.core_type = #tpu.core_type<tc>} {
    %c0 = arith.constant 0 : index
    %c0_0 = arith.constant 0 : index
    %0 = vector.load %arg0[%c0, %c0_0] : memref<8x128xf32, #tpu.memory_space<vmem>>, vector<8x128xf32>
    %c0_1 = arith.constant 0 : index
    %c0_2 = arith.constant 0 : index
    %1 = vector.load %arg3[%c0_1, %c0_2] : memref<256x512xf32, #tpu.memory_space<vmem>>, vector<128x512xf32>
    %cst = arith.constant dense<0.000000e+00> : vector<8x512xf32>
    %2 = tpu.matmul %0, %1, %cst {dimension_numbers = #tpu.dot_dimension_numbers<[1], [0], [0], [1], [0, 0, 1, 1], [], []>} : vector<8x128xf32>, vector<128x512xf32>, vector<8x512xf32> -> vector<8x512xf32>
    %c0_3 = arith.constant 0 : index
    %c0_4 = arith.constant 0 : index
    %3 = vector.load %arg1[%c0_3, %c0_4] : memref<8x128xf32, #tpu.memory_space<vmem>>, vector<8x128xf32>
    %c128 = arith.constant 128 : index
    %c0_5 = arith.constant 0 : index
    %4 = vector.load %arg3[%c128, %c0_5] : memref<256x512xf32, #tpu.memory_space<vmem>>, vector<128x512xf32>
    %cst_6 = arith.constant dense<0.000000e+00> : vector<8x512xf32>
    %5 = tpu.matmul %3, %4, %cst_6 {dimension_numbers = #tpu.dot_dimension_numbers<[1], [0], [0], [1], [0, 0, 1, 1], [], []>} : vector<8x128xf32>, vector<128x512xf32>, vector<8x512xf32> -> vector<8x512xf32>
    %6 = arith.addf %2, %5 : vector<8x512xf32>
    %c0_7 = arith.constant 0 : index
    %c0_8 = arith.constant 0 : index
    %7 = vector.load %arg4[%c0_7, %c0_8] : memref<1x512xf32, #tpu.memory_space<vmem>>, vector<1x512xf32>
    %8 = vector.broadcast %7 : vector<1x512xf32> to vector<8x512xf32>
    %9 = arith.addf %6, %8 : vector<8x512xf32>
    %c0_9 = arith.constant 0 : index
    %c0_10 = arith.constant 0 : index
    %10 = vector.load %arg2[%c0_9, %c0_10] : memref<8x128xf32, #tpu.memory_space<vmem>>, vector<8x128xf32>
    %11 = vector.extract_strided_slice %9 {offsets = [0, 0], sizes = [8, 384], strides = [1, 1]} : vector<8x512xf32> to vector<8x384xf32>
    %12 = arith.negf %11 : vector<8x384xf32>
    %13 = math.exp %12 : vector<8x384xf32>
    %cst_11 = arith.constant 1.000000e+00 : f32
    %14 = vector.broadcast %cst_11 : f32 to vector<8x384xf32>
    %15 = arith.addf %14, %13 : vector<8x384xf32>
    %16 = arith.divf %14, %15 : vector<8x384xf32>
    %17 = vector.extract_strided_slice %9 {offsets = [0, 384], sizes = [8, 128], strides = [1, 1]} : vector<8x512xf32> to vector<8x128xf32>
    %18 = math.tanh %17 : vector<8x128xf32>
    %19 = vector.extract_strided_slice %16 {offsets = [0, 0], sizes = [8, 128], strides = [1, 1]} : vector<8x384xf32> to vector<8x128xf32>
    %20 = vector.extract_strided_slice %16 {offsets = [0, 128], sizes = [8, 128], strides = [1, 1]} : vector<8x384xf32> to vector<8x128xf32>
    %21 = vector.extract_strided_slice %16 {offsets = [0, 256], sizes = [8, 128], strides = [1, 1]} : vector<8x384xf32> to vector<8x128xf32>
    %22 = arith.mulf %10, %20 : vector<8x128xf32>
    %23 = arith.mulf %19, %18 : vector<8x128xf32>
    %24 = arith.addf %22, %23 : vector<8x128xf32>
    %25 = math.tanh %24 : vector<8x128xf32>
    %26 = arith.mulf %21, %25 : vector<8x128xf32>
    %c0_12 = arith.constant 0 : index
    %c0_13 = arith.constant 0 : index
    %27 = vector.load %arg5[%c0_12, %c0_13] : memref<8x128xf32, #tpu.memory_space<vmem>>, vector<8x128xf32>
    tpu.vector_store %arg5[%c0_12, %c0_13], %26 {strides = array<i32>} : memref<8x128xf32, #tpu.memory_space<vmem>>, vector<8x128xf32>,
    %c0_14 = arith.constant 0 : index
    %c0_15 = arith.constant 0 : index
    %28 = vector.load %arg6[%c0_14, %c0_15] : memref<8x128xf32, #tpu.memory_space<vmem>>, vector<8x128xf32>
    tpu.vector_store %arg6[%c0_14, %c0_15], %24 {strides = array<i32>} : memref<8x128xf32, #tpu.memory_space<vmem>>, vector<8x128xf32>,
    return
  }
}

</mosaic_0001>

<bundles_post_ra>
// kernel: meta_lstm_cell_fused.1
= control target key start
LH: loop header
LB: loop body
LE: loop exit
PB: predicated region body
PF: predicated region fallthrough
CT: control target
= control target key end

     0   :  { %12 = vsyncpa [#allocation3], 0  ;;  %s798_s0 = inlined_call_operand.hbm [shape: f32[8,128], index: 0, kind: input, shape index: {}]   ;;  %s799_s1 = inlined_call_operand.hbm [shape: f32[8,128], index: 1, kind: input, shape index: {}]   ;;  %s800_s2 = inlined_call_operand.hbm [shape: f32[8,128], index: 2, kind: input, shape index: {}]   ;;  %s801_s3 = inlined_call_operand.hbm [shape: f32[256,512], index: 3, kind: input, shape index: {}]   ;;  %s802_s4 = inlined_call_operand.vmem [shape: f32[1,512], index: 4, kind: input, shape index: {}]   ;;  %s803_s5 = inlined_call_operand.hbm [shape: f32[8,128], index: 5, kind: output, shape index: {0}]   ;;  %s804_s6 = inlined_call_operand.hbm [shape: f32[8,128], index: 6, kind: output, shape index: {1}]  }
   0x1   :  { %13 = vsyncpa [#allocation6], 0 }
   0x2   :  { %14 = vsyncpa [#allocation9], 0 }
   0x3   :  { %15 = vsyncpa [#allocation4], 0 }
   0x4   :  { %16 = vsyncpa [#allocation12], 0  ;;  %s729_s21 = smov [#allocation5]   ;;  %s730_s23 = smov [#allocation2]  }
   0x5   :  { %s33_s22 = sshll.u32 %s729_s21, 4  ;;  %s23_s24 = sshll.u32 %s730_s23, 4  ;;  %s34_s22 = int_to_ptr.vmem [resolvable:$true] %s33_s22  ;;  %s24_s24 = int_to_ptr.vmem [resolvable:$true] %s23_s24 }
   0x6   :  { %s607_s25 = scalar_lea.vmem %s34_s22, 128  ;;  %p612_p1 = scmp.lt.s32.totalorder %s34_s22, %s34_s22 }
   0x7   :  { %p608_p0 = scmp.ne.s32.totalorder %s34_s22, %s607_s25  ;;  %p613_p2 = scmp.lt.s32.totalorder %s607_s25, %s607_s25 }
   0x9   :  { %p614_p3 = por %p613_p2, %p612_p1 }
   0xb   :  { %p615_p4 = pnand %p614_p3, %p608_p0 }
   0xd   :  { %618 = shalt.err (!%p615_p4)
}
   0xe   :  { %36 = dma.hbm_to_vmem [thread:$0]  %s799_s1, 128, %s34_s22, [#allocation6]  }
   0xf   :  { %s627_s28 = scalar_lea.vmem %s24_s24, 128  ;;  %p632_p6 = scmp.lt.s32.totalorder %s24_s24, %s24_s24 }
  0x10   :  { %p628_p5 = scmp.ne.s32.totalorder %s24_s24, %s627_s28  ;;  %p633_p7 = scmp.lt.s32.totalorder %s627_s28, %s627_s28 }
  0x12   :  { %p634_p8 = por %p633_p7, %p632_p6 }
  0x14   :  { %p635_p9 = pnand %p634_p8, %p628_p5 }
  0x16   :  { %638 = shalt.err (!%p635_p9)
}
  0x17   :  { %26 = dma.hbm_to_vmem [thread:$0]  %s798_s0, 128, %s24_s24, [#allocation3]  }
  0x18   :  { %s731_s7 = smov [#allocation7]   ;;  %s732_s9 = smov [#allocation8]  }
  0x19   :  { %s43_s8 = sshll.u32 %s731_s7, 4  ;;  %s52_s10 = sshll.u32 %s732_s9, 4  ;;  %s44_s8 = int_to_ptr.vmem [resolvable:$true] %s43_s8  ;;  %s53_s10 = int_to_ptr.vmem [resolvable:$true] %s52_s10 }
  0x1a   :  { %s647_s11 = scalar_lea.vmem %s44_s8, 128  ;;  %p652_p11 = scmp.lt.s32.totalorder %s44_s8, %s44_s8 }
  0x1b   :  { %p648_p10 = scmp.ne.s32.totalorder %s44_s8, %s647_s11  ;;  %p653_p12 = scmp.lt.s32.totalorder %s647_s11, %s647_s11 }
  0x1d   :  { %p654_p13 = por %p653_p12, %p652_p11 }
  0x1f   :  { %p655_p0 = pnand %p654_p13, %p648_p10 }
  0x21   :  { %658 = shalt.err (!%p655_p0)
}
  0x22   :  { %46 = dma.hbm_to_vmem [thread:$0]  %s800_s2, 128, %s44_s8, [#allocation6]  }
  0x23   :  { %s667_s13 = scalar_lea.vmem %s53_s10, 16384  ;;  %p672_p2 = scmp.lt.s32.totalorder %s53_s10, %s53_s10 }
  0x24   :  { %p668_p1 = scmp.ne.s32.totalorder %s53_s10, %s667_s13  ;;  %p673_p3 = scmp.lt.s32.totalorder %s667_s13, %s667_s13 }
  0x26   :  { %p674_p4 = por %p673_p3, %p672_p2 }
  0x28   :  { %p675_p5 = pnand %p674_p4, %p668_p1 }
  0x2a   :  { %678 = shalt.err (!%p675_p5)
}
  0x2b   :  { %s733_s0 = smov 512   ;;  %s734_s14 = smov 32  }
  0x2c   :  { %58 = dma.hbm_to_vmem [thread:$0]  %s801_s3, 16384, %s53_s10, [#allocation9], %s733_s0, %s733_s0, %s734_s14  }
  0x2d   :  { %719 = dma.done.wait [#allocation3], 128  }
  0x2e   :  { %720 = vsyncadd [#allocation3], 4294967168 }
  0x2f   :  { %721 = dma.done.wait [#allocation6], 256  }
  0x30   :  { %722 = vsyncadd [#allocation6], 4294967040 }
  0x31   :  { %723 = dma.done.wait [#allocation9], 16384  }
  0x32   :  { %724 = vsyncadd [#allocation9], 4294950912  ;;  %v735_v0 = vmov 0.0   ;;  %v200_v1 = vld [vmem:[#allocation8 + $0x3e8] sm:$0xff]  ;;  %v202_v2 = vld [vmem:[#allocation8 + $0x3f8] sm:$0xff] }
  0x33   :  { %267 = vmatprep.mubr.f32.mxu0 %v735_v0  ;;  %338 = vmatprep.mubr.f32.mxu1 %v735_v0  ;;  %v199_v3 = vld [vmem:[#allocation8 + $0x3e0] sm:$0xff]  ;;  %v201_v4 = vld [vmem:[#allocation8 + $0x3f0] sm:$0xff]  ;;  %v196_v5 = vld [vmem:[#allocation8 + $0x3c8] sm:$0xff] }
  0x34   :  { %203 = vmatprep.subr.mxu0 %v200_v1  ;;  %274 = vmatprep.subr.mxu1 %v202_v2  ;;  %v198_v6 = vld [vmem:[#allocation8 + $0x3d8] sm:$0xff]  ;;  %v195_v7 = vld [vmem:[#allocation8 + $0x3c0] sm:$0xff]  ;;  %v197_v8 = vld [vmem:[#allocation8 + $0x3d0] sm:$0xff] }
  0x35   :  { %204 = vmatpush1.msra.mxu0 %v199_v3  ;;  %275 = vmatpush1.msra.mxu1 %v201_v4  ;;  %v192_v9 = vld [vmem:[#allocation8 + $0x3a8] sm:$0xff]  ;;  %v194_v10 = vld [vmem:[#allocation8 + $0x3b8] sm:$0xff]  ;;  %v191_v11 = vld [vmem:[#allocation8 + $0x3a0] sm:$0xff] }
  0x36   :  { %205 = vmatprep.subr.mxu0 %v196_v5  ;;  %276 = vmatprep.subr.mxu1 %v198_v6  ;;  %v193_v12 = vld [vmem:[#allocation8 + $0x3b0] sm:$0xff]  ;;  %v188_v13 = vld [vmem:[#allocation8 + $0x388] sm:$0xff]  ;;  %v190_v14 = vld [vmem:[#allocation8 + $0x398] sm:$0xff] }
  0x37   :  { %206 = vmatpush1.msra.mxu0 %v195_v7  ;;  %277 = vmatpush1.msra.mxu1 %v197_v8  ;;  %v187_v15 = vld [vmem:[#allocation8 + $0x380] sm:$0xff]  ;;  %v189_v16 = vld [vmem:[#allocation8 + $0x390] sm:$0xff]  ;;  %v184_v17 = vld [vmem:[#allocation8 + $0x368] sm:$0xff] }
  0x38   :  { %207 = vmatprep.subr.mxu0 %v192_v9  ;;  %278 = vmatprep.subr.mxu1 %v194_v10  ;;  %v186_v18 = vld [vmem:[#allocation8 + $0x378] sm:$0xff]  ;;  %v183_v19 = vld [vmem:[#allocation8 + $0x360] sm:$0xff]  ;;  %v185_v20 = vld [vmem:[#allocation8 + $0x370] sm:$0xff] }
  0x39   :  { %208 = vmatpush1.msra.mxu0 %v191_v11  ;;  %279 = vmatpush1.msra.mxu1 %v193_v12  ;;  %v180_v21 = vld [vmem:[#allocation8 + $0x348] sm:$0xff]  ;;  %v182_v22 = vld [vmem:[#allocation8 + $0x358] sm:$0xff]  ;;  %v179_v23 = vld [vmem:[#allocation8 + $0x340] sm:$0xff] }
  0x3a   :  { %209 = vmatprep.subr.mxu0 %v188_v13  ;;  %280 = vmatprep.subr.mxu1 %v190_v14  ;;  %v181_v24 = vld [vmem:[#allocation8 + $0x350] sm:$0xff]  ;;  %v176_v25 = vld [vmem:[#allocation8 + $0x328] sm:$0xff]  ;;  %v178_v26 = vld [vmem:[#allocation8 + $0x338] sm:$0xff] }
  0x3b   :  { %210 = vmatpush1.msra.mxu0 %v187_v15  ;;  %281 = vmatpush1.msra.mxu1 %v189_v16  ;;  %v175_v27 = vld [vmem:[#allocation8 + $0x320] sm:$0xff]  ;;  %v177_v28 = vld [vmem:[#allocation8 + $0x330] sm:$0xff]  ;;  %v172_v29 = vld [vmem:[#allocation8 + $0x308] sm:$0xff] }
  0x3c   :  { %211 = vmatprep.subr.mxu0 %v184_v17  ;;  %282 = vmatprep.subr.mxu1 %v186_v18  ;;  %v174_v30 = vld [vmem:[#allocation8 + $0x318] sm:$0xff]  ;;  %v171_v31 = vld [vmem:[#allocation8 + $0x300] sm:$0xff]  ;;  %v173_v32 = vld [vmem:[#allocation8 + $0x310] sm:$0xff] }
  0x3d   :  { %212 = vmatpush1.msra.mxu0 %v183_v19  ;;  %283 = vmatpush1.msra.mxu1 %v185_v20  ;;  %v168_v33 = vld [vmem:[#allocation8 + $0x2e8] sm:$0xff]  ;;  %v170_v34 = vld [vmem:[#allocation8 + $0x2f8] sm:$0xff]  ;;  %v167_v35 = vld [vmem:[#allocation8 + $0x2e0] sm:$0xff] }
  0x3e   :  { %213 = vmatprep.subr.mxu0 %v180_v21  ;;  %284 = vmatprep.subr.mxu1 %v182_v22  ;;  %v169_v36 = vld [vmem:[#allocation8 + $0x2f0] sm:$0xff]  ;;  %v164_v37 = vld [vmem:[#allocation8 + $0x2c8] sm:$0xff]  ;;  %v166_v38 = vld [vmem:[#allocation8 + $0x2d8] sm:$0xff] }
  0x3f   :  { %214 = vmatpush1.msra.mxu0 %v179_v23  ;;  %285 = vmatpush1.msra.mxu1 %v181_v24  ;;  %v163_v39 = vld [vmem:[#allocation8 + $0x2c0] sm:$0xff]  ;;  %v165_v40 = vld [vmem:[#allocation8 + $0x2d0] sm:$0xff]  ;;  %v160_v41 = vld [vmem:[#allocation8 + $0x2a8] sm:$0xff] }
  0x40   :  { %215 = vmatprep.subr.mxu0 %v176_v25  ;;  %286 = vmatprep.subr.mxu1 %v178_v26  ;;  %v162_v42 = vld [vmem:[#allocation8 + $0x2b8] sm:$0xff]  ;;  %v159_v43 = vld [vmem:[#allocation8 + $0x2a0] sm:$0xff]  ;;  %v161_v44 = vld [vmem:[#allocation8 + $0x2b0] sm:$0xff] }
  0x41   :  { %216 = vmatpush1.msra.mxu0 %v175_v27  ;;  %287 = vmatpush1.msra.mxu1 %v177_v28  ;;  %v156_v45 = vld [vmem:[#allocation8 + $0x288] sm:$0xff]  ;;  %v158_v46 = vld [vmem:[#allocation8 + $0x298] sm:$0xff]  ;;  %v155_v47 = vld [vmem:[#allocation8 + $0x280] sm:$0xff] }
  0x42   :  { %217 = vmatprep.subr.mxu0 %v172_v29  ;;  %288 = vmatprep.subr.mxu1 %v174_v30  ;;  %v157_v48 = vld [vmem:[#allocation8 + $0x290] sm:$0xff]  ;;  %v152_v49 = vld [vmem:[#allocation8 + $0x268] sm:$0xff]  ;;  %v154_v50 = vld [vmem:[#allocation8 + $0x278] sm:$0xff] }
  0x43   :  { %218 = vmatpush1.msra.mxu0 %v171_v31  ;;  %289 = vmatpush1.msra.mxu1 %v173_v32  ;;  %v151_v51 = vld [vmem:[#allocation8 + $0x260] sm:$0xff]  ;;  %v153_v52 = vld [vmem:[#allocation8 + $0x270] sm:$0xff]  ;;  %v148_v53 = vld [vmem:[#allocation8 + $0x248] sm:$0xff] }
  0x44   :  { %219 = vmatprep.subr.mxu0 %v168_v33  ;;  %290 = vmatprep.subr.mxu1 %v170_v34  ;;  %v150_v54 = vld [vmem:[#allocation8 + $0x258] sm:$0xff]  ;;  %v147_v55 = vld [vmem:[#allocation8 + $0x240] sm:$0xff]  ;;  %v149_v56 = vld [vmem:[#allocation8 + $0x250] sm:$0xff] }
  0x45   :  { %220 = vmatpush1.msra.mxu0 %v167_v35  ;;  %291 = vmatpush1.msra.mxu1 %v169_v36  ;;  %v144_v57 = vld [vmem:[#allocation8 + $0x228] sm:$0xff]  ;;  %v146_v58 = vld [vmem:[#allocation8 + $0x238] sm:$0xff]  ;;  %v143_v59 = vld [vmem:[#allocation8 + $0x220] sm:$0xff] }
  0x46   :  { %221 = vmatprep.subr.mxu0 %v164_v37  ;;  %292 = vmatprep.subr.mxu1 %v166_v38  ;;  %v145_v60 = vld [vmem:[#allocation8 + $0x230] sm:$0xff]  ;;  %v140_v61 = vld [vmem:[#allocation8 + $0x208] sm:$0xff]  ;;  %v142_v62 = vld [vmem:[#allocation8 + $0x218] sm:$0xff] }
  0x47   :  { %222 = vmatpush1.msra.mxu0 %v163_v39  ;;  %293 = vmatpush1.msra.mxu1 %v165_v40  ;;  %v139_v63 = vld [vmem:[#allocation8 + $0x200] sm:$0xff]  ;;  %v141_v1 = vld [vmem:[#allocation8 + $0x210] sm:$0xff]  ;;  %v135_v3 = vld [vmem:[#allocation8 + $0x1e8] sm:$0xff] }
  0x48   :  { %223 = vmatprep.subr.mxu0 %v160_v41  ;;  %294 = vmatprep.subr.mxu1 %v162_v42  ;;  %v138_v2 = vld [vmem:[#allocation5] sm:$0xff]  ;;  %v137_v4 = vld [vmem:[#allocation8 + $0x1f8] sm:$0xff]  ;;  %v134_v5 = vld [vmem:[#allocation8 + $0x1e0] sm:$0xff] }
  0x49   :  { %224 = vmatpush1.msra.mxu0 %v159_v43  ;;  %295 = vmatpush1.msra.mxu1 %v161_v44  ;;  %v136_v6 = vld [vmem:[#allocation8 + $0x1f0] sm:$0xff]  ;;  %v131_v7 = vld [vmem:[#allocation8 + $0x1c8] sm:$0xff]  ;;  %v133_v8 = vld [vmem:[#allocation8 + $0x1d8] sm:$0xff] }
  0x4a   :  { %225 = vmatprep.subr.mxu0 %v156_v45  ;;  %296 = vmatprep.subr.mxu1 %v158_v46  ;;  %v130_v9 = vld [vmem:[#allocation8 + $0x1c0] sm:$0xff]  ;;  %v132_v10 = vld [vmem:[#allocation8 + $0x1d0] sm:$0xff]  ;;  %v127_v11 = vld [vmem:[#allocation8 + $0x1a8] sm:$0xff] }
  0x4b   :  { %226 = vmatpush1.msra.mxu0 %v155_v47  ;;  %297 = vmatpush1.msra.mxu1 %v157_v48  ;;  %v129_v12 = vld [vmem:[#allocation8 + $0x1b8] sm:$0xff]  ;;  %v126_v13 = vld [vmem:[#allocation8 + $0x1a0] sm:$0xff]  ;;  %v128_v14 = vld [vmem:[#allocation8 + $0x1b0] sm:$0xff] }
  0x4c   :  { %227 = vmatprep.subr.mxu0 %v152_v49  ;;  %298 = vmatprep.subr.mxu1 %v154_v50  ;;  %v123_v15 = vld [vmem:[#allocation8 + $0x188] sm:$0xff]  ;;  %v125_v16 = vld [vmem:[#allocation8 + $0x198] sm:$0xff]  ;;  %v122_v17 = vld [vmem:[#allocation8 + $0x180] sm:$0xff] }
  0x4d   :  { %228 = vmatpush1.msra.mxu0 %v151_v51  ;;  %299 = vmatpush1.msra.mxu1 %v153_v52  ;;  %v124_v18 = vld [vmem:[#allocation8 + $0x190] sm:$0xff]  ;;  %v119_v19 = vld [vmem:[#allocation8 + $0x168] sm:$0xff]  ;;  %v121_v20 = vld [vmem:[#allocation8 + $0x178] sm:$0xff] }
  0x4e   :  { %229 = vmatprep.subr.mxu0 %v148_v53  ;;  %300 = vmatprep.subr.mxu1 %v150_v54  ;;  %v118_v21 = vld [vmem:[#allocation8 + $0x160] sm:$0xff]  ;;  %v120_v22 = vld [vmem:[#allocation8 + $0x170] sm:$0xff]  ;;  %v115_v23 = vld [vmem:[#allocation8 + $0x148] sm:$0xff] }
  0x4f   :  { %230 = vmatpush1.msra.mxu0 %v147_v55  ;;  %301 = vmatpush1.msra.mxu1 %v149_v56  ;;  %v117_v24 = vld [vmem:[#allocation8 + $0x158] sm:$0xff]  ;;  %v114_v25 = vld [vmem:[#allocation8 + $0x140] sm:$0xff]  ;;  %v116_v26 = vld [vmem:[#allocation8 + $0x150] sm:$0xff] }
  0x50   :  { %231 = vmatprep.subr.mxu0 %v144_v57  ;;  %302 = vmatprep.subr.mxu1 %v146_v58  ;;  %v111_v27 = vld [vmem:[#allocation8 + $0x128] sm:$0xff]  ;;  %v113_v28 = vld [vmem:[#allocation8 + $0x138] sm:$0xff]  ;;  %v110_v29 = vld [vmem:[#allocation8 + $0x120] sm:$0xff] }
  0x51   :  { %232 = vmatpush1.msra.mxu0 %v143_v59  ;;  %303 = vmatpush1.msra.mxu1 %v145_v60  ;;  %v112_v30 = vld [vmem:[#allocation8 + $0x130] sm:$0xff]  ;;  %v107_v31 = vld [vmem:[#allocation8 + $0x108] sm:$0xff]  ;;  %v109_v32 = vld [vmem:[#allocation8 + $0x118] sm:$0xff] }
  0x52   :  { %233 = vmatprep.subr.mxu0 %v140_v61  ;;  %304 = vmatprep.subr.mxu1 %v142_v62  ;;  %v106_v33 = vld [vmem:[#allocation8 + $0x100] sm:$0xff]  ;;  %v108_v34 = vld [vmem:[#allocation8 + $0x110] sm:$0xff]  ;;  %v103_v35 = vld [vmem:[#allocation8 + $0xe8] sm:$0xff] }
  0x53   :  { %234 = vmatpush1.msra.mxu0 %v139_v63  ;;  %305 = vmatpush1.msra.mxu1 %v141_v1  ;;  %v105_v36 = vld [vmem:[#allocation8 + $0xf8] sm:$0xff]  ;;  %v102_v37 = vld [vmem:[#allocation8 + $0xe0] sm:$0xff]  ;;  %v104_v38 = vld [vmem:[#allocation8 + $0xf0] sm:$0xff] }
  0x54   :  { %268 = vmatmul.mubr.f32.vlgmr.msra.gmra.mxu0 %v138_v2  ;;  %345 = vmatprep.subr.mxu0 %v135_v3  ;;  %v99_v39 = vld [vmem:[#allocation8 + $0xc8] sm:$0xff]  ;;  %v101_v40 = vld [vmem:[#allocation8 + $0xd8] sm:$0xff]  ;;  %v98_v41 = vld [vmem:[#allocation8 + $0xc0] sm:$0xff] }
  0x55   :  { %416 = vmatprep.subr.mxu1 %v137_v4  ;;  %339 = vmatmul.mubr.f32.vlgmr.msra.gmra.mxu1 %v138_v2  ;;  %v100_v42 = vld [vmem:[#allocation8 + $0xd0] sm:$0xff]  ;;  %v95_v43 = vld [vmem:[#allocation8 + $0xa8] sm:$0xff]  ;;  %v97_v44 = vld [vmem:[#allocation8 + $0xb8] sm:$0xff] }
  0x56   :  { %346 = vmatpush1.msra.mxu0 %v134_v5  ;;  %417 = vmatpush1.msra.mxu1 %v136_v6  ;;  %v94_v45 = vld [vmem:[#allocation8 + $0xa0] sm:$0xff]  ;;  %v96_v46 = vld [vmem:[#allocation8 + $0xb0] sm:$0xff]  ;;  %v91_v47 = vld [vmem:[#allocation8 + $0x88] sm:$0xff]  ;;  %v489_v5 = vlaneseq }
  0x57   :  { %347 = vmatprep.subr.mxu0 %v131_v7  ;;  %418 = vmatprep.subr.mxu1 %v133_v8  ;;  %v93_v48 = vld [vmem:[#allocation8 + $0x98] sm:$0xff]  ;;  %v90_v49 = vld [vmem:[#allocation8 + $0x80] sm:$0xff]  ;;  %v92_v50 = vld [vmem:[#allocation8 + $0x90] sm:$0xff] }
  0x58   :  { %348 = vmatpush1.msra.mxu0 %v130_v9  ;;  %419 = vmatpush1.msra.mxu1 %v132_v10  ;;  %v87_v51 = vld [vmem:[#allocation8 + $0x68] sm:$0xff]  ;;  %v89_v52 = vld [vmem:[#allocation8 + $0x78] sm:$0xff]  ;;  %v86_v53 = vld [vmem:[#allocation8 + $0x60] sm:$0xff]  ;;  %v490_v6 = vshrl.u32 %v489_v5, 7 }
  0x59   :  { %349 = vmatprep.subr.mxu0 %v127_v11  ;;  %420 = vmatprep.subr.mxu1 %v129_v12  ;;  %v88_v54 = vld [vmem:[#allocation8 + $0x70] sm:$0xff]  ;;  %v83_v55 = vld [vmem:[#allocation8 + $0x48] sm:$0xff]  ;;  %v85_v56 = vld [vmem:[#allocation8 + $0x58] sm:$0xff] }
  0x5a   :  { %350 = vmatpush1.msra.mxu0 %v126_v13  ;;  %421 = vmatpush1.msra.mxu1 %v128_v14  ;;  %v82_v57 = vld [vmem:[#allocation8 + $0x40] sm:$0xff]  ;;  %v84_v58 = vld [vmem:[#allocation8 + $0x50] sm:$0xff]  ;;  %v79_v59 = vld [vmem:[#allocation8 + $0x28] sm:$0xff]  ;;  %v491_v8 = vsub.s32 0, %v490_v6  ;;  %v495_v10 = vsub.s32 1, %v490_v6 }
  0x5b   :  { %351 = vmatprep.subr.mxu0 %v123_v15  ;;  %422 = vmatprep.subr.mxu1 %v125_v16  ;;  %v81_v60 = vld [vmem:[#allocation8 + $0x38] sm:$0xff]  ;;  %v78_v61 = vld [vmem:[#allocation8 + $0x20] sm:$0xff]  ;;  %v80_v62 = vld [vmem:[#allocation8 + $0x30] sm:$0xff] }
  0x5c   :  { %352 = vmatpush1.msra.mxu0 %v122_v17  ;;  %423 = vmatpush1.msra.mxu1 %v124_v18  ;;  %v75_v63 = vld [vmem:[#allocation8 + $0x8] sm:$0xff]  ;;  %v77_v1 = vld [vmem:[#allocation8 + $0x18] sm:$0xff]  ;;  %v74_v2 = vld [vmem:[#allocation8] sm:$0xff] }
  0x5d   :  { %353 = vmatprep.subr.mxu0 %v119_v19  ;;  %424 = vmatprep.subr.mxu1 %v121_v20  ;;  %v76_v3 = vld [vmem:[#allocation8 + $0x10] sm:$0xff]  ;;  %v73_v4 = vld [vmem:[#allocation2] sm:$0xff] }
  0x5e   :  { %354 = vmatpush1.msra.mxu0 %v118_v21  ;;  %425 = vmatpush1.msra.mxu1 %v120_v22  ;;  %v487_v9 = vld [vmem:[%s802_s4] sm:$0xf]  ;;  %v499_v22 = vsub.s32 2, %v490_v6  ;;  %s736_s4 = smov [#allocation11]  }
  0x5f   :  { %355 = vmatprep.subr.mxu0 %v115_v23  ;;  %426 = vmatprep.subr.mxu1 %v117_v24  ;;  %v492_v12 = vrot.slane %v487_v9, %v491_v8  ;;  %v496_v16 = vrot.slane %v487_v9, %v495_v10  ;;  %s556_s17 = sshll.u32 %s736_s4, 4  ;;  %s557_s17 = int_to_ptr.vmem [resolvable:$true] %s556_s17 }
  0x60   :  { %356 = vmatpush1.msra.mxu0 %v114_v25  ;;  %427 = vmatpush1.msra.mxu1 %v116_v26  ;;  %v500_v26 = vrot.slane %v487_v9, %v499_v22  ;;  %s679_s18 = scalar_lea.vmem %s557_s17, 128  ;;  %p684_p7 = scmp.lt.s32.totalorder %s557_s17, %s557_s17 }
  0x61   :  { %357 = vmatprep.subr.mxu0 %v111_v27  ;;  %428 = vmatprep.subr.mxu1 %v113_v28  ;;  %v503_v27 = vsub.s32 3, %v490_v6  ;;  %p680_p6 = scmp.ne.s32.totalorder %s557_s17, %s679_s18  ;;  %p685_p8 = scmp.lt.s32.totalorder %s679_s18, %s679_s18 }
  0x62   :  { %358 = vmatpush1.msra.mxu0 %v110_v29  ;;  %429 = vmatpush1.msra.mxu1 %v112_v30 }
  0x63   :  { %359 = vmatprep.subr.mxu0 %v107_v31  ;;  %430 = vmatprep.subr.mxu1 %v109_v32  ;;  %v504_v31 = vrot.slane %v487_v9, %v503_v27  ;;  %p686_p9 = por %p685_p8, %p684_p7 }
  0x64   :  { %360 = vmatpush1.msra.mxu0 %v106_v33  ;;  %431 = vmatpush1.msra.mxu1 %v108_v34 }
  0x65   :  { %361 = vmatprep.subr.mxu0 %v103_v35  ;;  %432 = vmatprep.subr.mxu1 %v105_v36  ;;  %p687_p10 = pnand %p686_p9, %p680_p6 }
  0x66   :  { %362 = vmatpush1.msra.mxu0 %v102_v37  ;;  %433 = vmatpush1.msra.mxu1 %v104_v38 }
  0x67   :  { %363 = vmatprep.subr.mxu0 %v99_v39  ;;  %434 = vmatprep.subr.mxu1 %v101_v40  ;;  %v513_v40 = vld [vmem:[#allocation7] sm:$0xff] }
  0x68   :  { %364 = vmatpush1.msra.mxu0 %v98_v41  ;;  %435 = vmatpush1.msra.mxu1 %v100_v42 }
  0x69   :  { %365 = vmatprep.subr.mxu0 %v95_v43  ;;  %436 = vmatprep.subr.mxu1 %v97_v44 }
  0x6a   :  { %366 = vmatpush1.msra.mxu0 %v94_v45  ;;  %437 = vmatpush1.msra.mxu1 %v96_v46 }
  0x6b   :  { %367 = vmatprep.subr.mxu0 %v91_v47  ;;  %438 = vmatprep.subr.mxu1 %v93_v48 }
  0x6c   :  { %368 = vmatpush1.msra.mxu0 %v90_v49  ;;  %439 = vmatpush1.msra.mxu1 %v92_v50 }
  0x6d   :  { %369 = vmatprep.subr.mxu0 %v87_v51  ;;  %440 = vmatprep.subr.mxu1 %v89_v52 }
  0x6e   :  { %370 = vmatpush1.msra.mxu0 %v86_v53  ;;  %441 = vmatpush1.msra.mxu1 %v88_v54 }
  0x6f   :  { %371 = vmatprep.subr.mxu0 %v83_v55  ;;  %442 = vmatprep.subr.mxu1 %v85_v56 }
  0x70   :  { %372 = vmatpush1.msra.mxu0 %v82_v57  ;;  %443 = vmatpush1.msra.mxu1 %v84_v58 }
  0x71   :  { %373 = vmatprep.subr.mxu0 %v79_v59  ;;  %444 = vmatprep.subr.mxu1 %v81_v60 }
  0x72   :  { %374 = vmatpush1.msra.mxu0 %v78_v61  ;;  %445 = vmatpush1.msra.mxu1 %v80_v62 }
  0x73   :  { %375 = vmatprep.subr.mxu0 %v75_v63  ;;  %446 = vmatprep.subr.mxu1 %v77_v1 }
  0x74   :  { %376 = vmatpush1.msra.mxu0 %v74_v2  ;;  %409 = vmatprep.mubr.f32.mxu0 %v735_v0 }
  0x75   :  { %447 = vmatpush1.msra.mxu1 %v76_v3  ;;  %480 = vmatprep.mubr.f32.mxu1 %v735_v0 }
  0x76   :  { %410 = vmatmul.mubr.f32.vlgmr.msra.gmra.mxu0 %v73_v4  ;;  %481 = vmatmul.mubr.f32.vlgmr.msra.gmra.mxu1 %v73_v4 }
 0x114   :  { %v269_v7 = vpop.f32.mrf.mxu0 }
 0x115   :  { %v340_v14 = vpop.f32.mrf.mxu1 }
 0x116   :  { %v271_v11 = vpop.f32.mrf.mxu0 }
 0x117   :  { %v342_v19 = vpop.f32.mrf.mxu1 }
 0x136   :  { %v411_v13 = vpop.f32.mrf.mxu0  ;;  %v482_v23 = vpop.f32.mrf.mxu1 }
 0x137   :  { %v412_v15 = vadd.f32 %v411_v13, %v269_v7  ;;  %v483_v25 = vadd.f32 %v482_v23, %v340_v14 }
 0x138   :  { %v413_v17 = vpop.f32.mrf.mxu0  ;;  %v484_v28 = vpop.f32.mrf.mxu1 }
 0x139   :  { %v509_v18 = vadd.f32 %v492_v12, %v412_v15  ;;  %v414_v0 = vadd.f32 %v413_v17, %v271_v11  ;;  %v511_v29 = vadd.f32 %v500_v26, %v483_v25  ;;  %v485_v30 = vadd.f32 %v484_v28, %v342_v19 }
 0x13b   :  { %v571_v20 = vmul.f32 -1.442695, %v509_v18  ;;  %v510_v21 = vadd.f32 %v496_v16, %v414_v0  ;;  %v573_v32 = vmul.f32 -1.442695, %v511_v29  ;;  %v512_v34 = vadd.f32 %v504_v31, %v485_v30 }
 0x13d   :  { %583 = vpow2.f32 %v571_v20  ;;  %v572_v24 = vmul.f32 -1.442695, %v510_v21 }
 0x13f   :  { %585 = vpow2.f32 %v572_v24 }
 0x140   :  { %587 = vpow2.f32 %v573_v32 }
 0x14a   :  { %v584_v33 = vpop.eup %583 }
 0x14b   :  { %v523_v35 = vadd.f32 1.0, %v584_v33 }
 0x14c   :  { %v586_v36 = vpop.eup %585 }
 0x14d   :  { %589 = vrcp.f32 %v523_v35  ;;  %v524_v37 = vadd.f32 1.0, %v586_v36  ;;  %v588_v38 = vpop.eup %587 }
 0x14e   :  { %591 = vtanh.f32 %v512_v34  ;;  %v525_v43 = vadd.f32 1.0, %v588_v38 }
 0x14f   :  { %593 = vrcp.f32 %v524_v37 }
 0x150   :  { %595 = vrcp.f32 %v525_v43 }
 0x15a   :  { %v590_v39 = vpop.eup %589 }
 0x15b   :  { %v592_v41 = vpop.eup %591 }
 0x15c   :  { %v594_v42 = vpop.eup %593  ;;  %v534_v45 = vmul.f32 %v592_v41, %v590_v39 }
 0x15d   :  { %v533_v44 = vmul.f32 %v594_v42, %v513_v40 }
 0x15f   :  { %v535_v46 = vadd.f32 %v534_v45, %v533_v44 }
 0x161   :  { %539 = vst [vmem:[#allocation11] sm:$0xff] %v535_v46  ;;  %597 = vtanh.f32 %v535_v46 }
 0x162   :  { %690 = shalt.err (!%p687_p10)
}
 0x163   :  { %559 = dma.vmem_to_hbm [thread:$0]  %s557_s17, 128, %s804_s6, [#allocation12]   ;;  %v596_v47 = vpop.eup %595 }
 0x164   :  { %s737_s21 = smov [#allocation10]  }
 0x165   :  { %s546_s22 = sshll.u32 %s737_s21, 4  ;;  %s547_s22 = int_to_ptr.vmem [resolvable:$true] %s546_s22 }
 0x166   :  { %s699_s23 = scalar_lea.vmem %s547_s22, 128  ;;  %p704_p12 = scmp.lt.s32.totalorder %s547_s22, %s547_s22 }
 0x167   :  { %p700_p11 = scmp.ne.s32.totalorder %s547_s22, %s699_s23  ;;  %p705_p13 = scmp.lt.s32.totalorder %s699_s23, %s699_s23 }
 0x169   :  { %p706_p0 = por %p705_p13, %p704_p12 }
 0x16b   :  { %p707_p1 = pnand %p706_p0, %p700_p11 }
 0x16e   :  { %v598_v48 = vpop.eup %597 }
 0x16f   :  { %v537_v49 = vmul.f32 %v598_v48, %v596_v47 }
 0x171   :  { %538 = vst [vmem:[#allocation10] sm:$0xff] %v537_v49 }
 0x172   :  { %710 = shalt.err (!%p707_p1)
}
 0x173   :  { %549 = dma.vmem_to_hbm [thread:$0]  %s547_s22, 128, %s803_s5, [#allocation4]  }
 0x174   :  { %725 = dma.done.wait [#allocation4], 128  }
 0x175   :  { %726 = vsyncadd [#allocation4], 4294967168 }
 0x176   :  { %727 = dma.done.wait [#allocation12], 128  }
 0x177   :  { %728 = vsyncadd [#allocation12], 4294967168 }
 0x178   :  { %566 = vsyncpa [#allocation3], 1 }
 0x179   :  { %567 = vsyncpa [#allocation6], 1 }
 0x17a   :  { %568 = vsyncpa [#allocation9], 1 }
 0x17b   :  { %569 = vsyncpa [#allocation4], 1 }
 0x17c   :  { %570 = vsyncpa [#allocation12], 1 }

</bundles_post_ra>
